<compile_context>
chip_gen: v7x
topology: tpu7x:2x2x1
jax: 0.10.0
libtpu: 0.0.40
codegen_flags: <defaults>
</compile_context>

<pallas_src>
import functools

import jax
import jax.numpy as jnp
from jax import lax
from jax.experimental import pallas as pl
from jax.experimental.pallas import tpu as pltpu


# ----------------------------------------------------------------------------
# Mini-VGG16 configuration (channels scaled down from [64, 128, 256, 512]).
# ----------------------------------------------------------------------------
BLOCKS = [
    (2, 8),    # block1: conv1_1, conv1_2
    (2, 16),   # block2: conv2_1, conv2_2
    (3, 32),   # block3: conv3_1 .. conv3_3
    (3, 64),   # block4: conv4_1 .. conv4_3 (network stops at relu4_3)
]
CONTENT_LAYERS = ("relu2_2",)
STYLE_LAYERS = ("relu1_2", "relu2_2", "relu3_3", "relu4_3")

CONTENT_WEIGHT = 1.0
STYLE_WEIGHT = 100000.0
TV_WEIGHT = 0.0

ACT_DTYPE = jnp.bfloat16  # activations cross HBM in bf16


# ----------------------------------------------------------------------------
# Pallas kernels
# ----------------------------------------------------------------------------
def _conv3x3_relu_kernel(x_ref, w_ref, b_ref, o_ref):
    """3x3 conv + bias + ReLU, whole (small) batch in one grid step.

    x_ref: (B, H+2, (W+2)*Cin)    bf16, spatially padded, width-packed rows
    w_ref: (3, (W+2)*Cin, W*Cout) bf16, banded weights (dx taps folded in)
    b_ref: (1, W*Cout)            f32, bias tiled across W
    o_ref: (B, H, W*Cout)         bf16, lane-dense (W*Cout == 128 at all layers)
    """
    nb, h, n = o_ref.shape
    bias = b_ref[...]
    for b in range(nb):                        # static unroll over the batch
        xb = x_ref[b].astype(jnp.float32)      # load/cast once, slice the value
        acc = jnp.zeros((h, n), jnp.float32)
        for dy in range(3):                    # 3 row-shifted MXU matmuls
            lhs = xb[dy:dy + h, :].astype(jnp.bfloat16)
            acc = acc + jnp.dot(lhs, w_ref[dy],
                                preferred_element_type=jnp.float32)
        o_ref[b] = jnp.maximum(acc + bias, 0.0).astype(o_ref.dtype)


def _conv3x3_relu_pool_kernel(x_ref, w_ref, b_ref, feat_ref, pool_ref, scr_ref):
    """Conv + bias + ReLU with the 2x2/stride-2 max-pool fused into the epilogue.

    The banded weight permutes output columns to [w even ..., w odd ...], so
    horizontal pool pairs are the two lane halves of the (H, 128) relu tile;
    vertical pairs are a stride-2 row slice of a small f32 scratch.  Emits both
    the pre-pool features (for the losses; w order permuted, which Gram/MSE do
    not care about) and the pooled activation (natural w order).
    """
    nb, h, n = feat_ref.shape
    ho, half = h // 2, n // 2
    bias = b_ref[...]
    for b in range(nb):
        xb = x_ref[b].astype(jnp.float32)
        acc = jnp.zeros((h, n), jnp.float32)
        for dy in range(3):
            lhs = xb[dy:dy + h, :].astype(jnp.bfloat16)
            acc = acc + jnp.dot(lhs, w_ref[dy],
                                preferred_element_type=jnp.float32)
        y = jnp.maximum(acc + bias, 0.0)
        feat_ref[b] = y.astype(feat_ref.dtype)
        # horizontal 2x max: adjacent output columns sit in opposite lane halves
        scr_ref[...] = jnp.maximum(y[:, :half], y[:, half:])
        # vertical 2x max: stride-2 row pairs read back from the f32 scratch
        p = jnp.maximum(scr_ref[pl.ds(0, ho, stride=2), :],
                        scr_ref[pl.ds(1, ho, stride=2), :])
        pool_ref[b] = p.astype(pool_ref.dtype)


def _gram_kernel(f_ref, o_ref, *, inv_denom):
    """Per-sample Gram: f:(1, N, C) bf16 -> o:(1, C, C) f32 = F^T F / (C*N)."""
    f = f_ref[0]
    g = lax.dot_general(f, f, (((0,), (0,)), ((), ())),
                        preferred_element_type=jnp.float32)
    o_ref[...] = (g * inv_denom)[None]


def _gram_ssd_kernel(f_ref, gt_ref, o_ref, *, inv_denom):
    """Fused Gram + SSD vs. a target Gram, accumulated over the batch grid.

    f_ref: (1, N, C) bf16 features; gt_ref: (1, C, C) f32 target; o_ref: (1, 1).
    """
    @pl.when(pl.program_id(0) == 0)
    def _():
        o_ref[...] = jnp.zeros_like(o_ref)

    f = f_ref[0]
    g = lax.dot_general(f, f, (((0,), (0,)), ((), ())),
                        preferred_element_type=jnp.float32) * inv_denom
    d = g - gt_ref[0]
    s = jnp.sum(d * d, axis=1, keepdims=True)
    o_ref[...] += jnp.sum(s, axis=0, keepdims=True)


def _ssd_kernel(a_ref, b_ref, o_ref):
    """Sum of squared differences over a lane-dense (-1, 128) tile."""
    d = a_ref[...].astype(jnp.float32) - b_ref[...].astype(jnp.float32)
    s = jnp.sum(d * d, axis=1, keepdims=True)
    o_ref[...] = jnp.sum(s, axis=0, keepdims=True)


def _tv_kernel(x_ref, o_ref):
    """L2 total variation of one image x:(1, H, W, C) -> (1, 1, 1).

    Only traced when tv_weight != 0 (it is 0 by default).
    """
    x = x_ref[0].astype(jnp.float32)
    dh = x[1:, :, :] - x[:-1, :, :]
    dw = x[:, 1:, :] - x[:, :-1, :]

    def ssq(v):
        s = jnp.sum(v * v, axis=2, keepdims=True)
        s = jnp.sum(s, axis=1, keepdims=True)
        return jnp.sum(s, axis=0, keepdims=True)

    o_ref[...] = ssq(dh) + ssq(dw)


# ----------------------------------------------------------------------------
# Wrappers (thin JAX glue; only cheap pads / contiguous reshapes outside Pallas)
# ----------------------------------------------------------------------------
def _pack_padded(x):
    """NHWC (B, H, W, C) -> (B, H+2, (W+2)*C) zero-padded, width-packed, bf16.

    # TODO(synk): for large layers write the halo directly from the producing
    # kernel instead of a per-layer jnp.pad round trip (review item 11).
    """
    b, h, w, c = x.shape
    xp = jnp.pad(x, ((0, 0), (1, 1), (1, 1), (0, 0)))
    return xp.reshape(b, h + 2, (w + 2) * c).astype(ACT_DTYPE)


def conv3x3_relu(x, w_band, b_row):
    """3x3 / pad 1 / stride 1 conv + bias + ReLU.  x: (B, H, W, Cin) NHWC bf16."""
    b, h, w, cin = x.shape
    cout = b_row.shape[1] // w
    k, n = (w + 2) * cin, w * cout
    xp = _pack_padded(x)
    out = pl.pallas_call(
        _conv3x3_relu_kernel,
        out_shape=jax.ShapeDtypeStruct((b, h, n), ACT_DTYPE),
        grid=(1,),
        in_specs=[
            pl.BlockSpec((b, h + 2, k), lambda i: (0, 0, 0)),
            pl.BlockSpec((3, k, n), lambda i: (0, 0, 0)),
            pl.BlockSpec((1, n), lambda i: (0, 0)),
        ],
        out_specs=pl.BlockSpec((b, h, n), lambda i: (0, 0, 0)),
        compiler_params=pltpu.CompilerParams(dimension_semantics=("arbitrary",)),
    )(xp, w_band, b_row)
    return out.reshape(b, h, w, cout)


def conv3x3_relu_pool(x, w_band_perm, b_row):
    """Fused conv + bias + ReLU + 2x2 max-pool.  Returns (features, pooled)."""
    b, h, w, cin = x.shape
    cout = b_row.shape[1] // w
    k, n = (w + 2) * cin, w * cout
    ho, wo, half = h // 2, w // 2, (w // 2) * cout
    xp = _pack_padded(x)
    feat, pooled = pl.pallas_call(
        _conv3x3_relu_pool_kernel,
        out_shape=(jax.ShapeDtypeStruct((b, h, n), ACT_DTYPE),
                   jax.ShapeDtypeStruct((b, ho, half), ACT_DTYPE)),
        grid=(1,),
        in_specs=[
            pl.BlockSpec((b, h + 2, k), lambda i: (0, 0, 0)),
            pl.BlockSpec((3, k, n), lambda i: (0, 0, 0)),
            pl.BlockSpec((1, n), lambda i: (0, 0)),
        ],
        out_specs=(pl.BlockSpec((b, h, n), lambda i: (0, 0, 0)),
                   pl.BlockSpec((b, ho, half), lambda i: (0, 0, 0))),
        scratch_shapes=[pltpu.VMEM((h, half), jnp.float32)],
        compiler_params=pltpu.CompilerParams(dimension_semantics=("arbitrary",)),
    )(xp, w_band_perm, b_row)
    return feat.reshape(b, h, w, cout), pooled.reshape(b, ho, wo, cout)


def gram_matrix(feats_nhwc):
    """feats (B, H, W, C) bf16 -> per-sample Gram (B, C, C) f32, / (C*H*W)."""
    b, h, w, c = feats_nhwc.shape
    n = h * w
    f = feats_nhwc.reshape(b, n, c)
    kern = functools.partial(_gram_kernel, inv_denom=1.0 / float(c * n))
    return pl.pallas_call(
        kern,
        out_shape=jax.ShapeDtypeStruct((b, c, c), jnp.float32),
        grid=(b,),
        in_specs=[pl.BlockSpec((1, n, c), lambda i: (i, 0, 0))],
        out_specs=pl.BlockSpec((1, c, c), lambda i: (i, 0, 0)),
        compiler_params=pltpu.CompilerParams(dimension_semantics=("parallel",)),
    )(f)


def style_layer_mse(feats_nhwc, gram_target):
    """Fused (Gram of feats) vs. target-Gram MSE, SSD accumulated over batch."""
    b, h, w, c = feats_nhwc.shape
    n = h * w
    f = feats_nhwc.reshape(b, n, c)
    kern = functools.partial(_gram_ssd_kernel, inv_denom=1.0 / float(c * n))
    ssd = pl.pallas_call(
        kern,
        out_shape=jax.ShapeDtypeStruct((1, 1), jnp.float32),
        grid=(b,),
        in_specs=[
            pl.BlockSpec((1, n, c), lambda i: (i, 0, 0)),
            pl.BlockSpec((1, c, c), lambda i: (0, 0, 0)),  # target resident
        ],
        out_specs=pl.BlockSpec((1, 1), lambda i: (0, 0)),
        compiler_params=pltpu.CompilerParams(dimension_semantics=("arbitrary",)),
    )(f, gram_target)
    return ssd[0, 0] / float(b * c * c)


def mse(a, b):
    """MSE via a single lane-dense SSD kernel (tiny tensors at these sizes).

    # TODO(synk): tile rows (grid + accumulating output) for large activations.
    """
    assert a.shape == b.shape
    lane = 128 if a.size % 128 == 0 else a.shape[-1]
    a2 = a.reshape(-1, lane)
    b2 = b.reshape(-1, lane)
    ssd = pl.pallas_call(
        _ssd_kernel,
        out_shape=jax.ShapeDtypeStruct((1, 1), jnp.float32),
        grid=(1,),
        in_specs=[pl.BlockSpec(a2.shape, lambda i: (0, 0)),
                  pl.BlockSpec(b2.shape, lambda i: (0, 0))],
        out_specs=pl.BlockSpec((1, 1), lambda i: (0, 0)),
        compiler_params=pltpu.CompilerParams(dimension_semantics=("arbitrary",)),
    )(a2, b2)
    return ssd[0, 0] / float(a.size)


def total_variation(x):
    b = x.shape[0]
    out = pl.pallas_call(
        _tv_kernel,
        out_shape=jax.ShapeDtypeStruct((b, 1, 1), jnp.float32),
        grid=(b,),
        in_specs=[pl.BlockSpec((1,) + x.shape[1:], lambda i: (i, 0, 0, 0))],
        out_specs=pl.BlockSpec((1, 1, 1), lambda i: (i, 0, 0)),
        compiler_params=pltpu.CompilerParams(dimension_semantics=("parallel",)),
    )(x)
    return jnp.sum(out)


# ----------------------------------------------------------------------------
# Mini-VGG16 parameters & feature extraction
# ----------------------------------------------------------------------------
def _band_conv_weights(k, width, pool_permute=False):
    """Fold the 3 horizontal taps of a 3x3 kernel into a banded matrix.

    k: (3, 3, Cin, Cout) -> (3, (width+2)*Cin, width*Cout).  If pool_permute,
    the output columns are reordered to [w even ..., w odd ...] so a fused 2x2
    max-pool can pair horizontal neighbours via the two lane halves.
    # TODO(synk): for wide images switch to per-tap (Cin, Cout) matmuls — the
    # banded K wastes ~(W+2)/3x MXU FLOPs (matters first on v5e).
    """
    _, _, cin, cout = k.shape
    eye = jnp.eye(width, dtype=jnp.float32)
    bands = []
    for dy in range(3):
        t = jnp.zeros(((width + 2) * cin, width * cout), jnp.float32)
        for dx in range(3):
            sel = jnp.zeros((width + 2, width), jnp.float32)
            sel = sel.at[dx:dx + width, :].set(eye)      # sel[w+dx, w] = 1
            t = t + jnp.kron(sel, k[dy, dx])
        bands.append(t)
    bands = jnp.stack(bands)
    if pool_permute:
        w_order = jnp.concatenate([jnp.arange(0, width, 2),
                                   jnp.arange(1, width, 2)])
        cols = (w_order[:, None] * cout +
                jnp.arange(cout)[None, :]).reshape(-1)
        bands = jnp.take(bands, cols, axis=2)
    return bands


def init_params(key, width):
    """Deterministic stand-in for the IMAGENET1K_V1 VGG16 conv weights."""
    params = []
    cin = 3
    w_sp = width
    for bi, (nconv, cout) in enumerate(BLOCKS):
        for ci in range(nconv):
            key, kw, kb = jax.random.split(key, 3)
            k = jax.random.normal(kw, (3, 3, cin, cout), jnp.float32) * 0.1
            bias = jax.random.normal(kb, (cout,), jnp.float32) * 0.01
            cin_p = max(cin, 8)                       # pad Cin=3 -> 8 (aligned K)
            if cin_p != cin:
                k = jnp.pad(k, ((0, 0), (0, 0), (0, cin_p - cin), (0, 0)))
            pooled = (ci == nconv - 1) and (bi < len(BLOCKS) - 1)
            w_band = _band_conv_weights(k, w_sp,
                                        pool_permute=pooled).astype(jnp.bfloat16)
            b_row = jnp.tile(bias.reshape(1, cout), (1, w_sp))
            params.append((w_band, b_row))
            cin = cout
        if bi < len(BLOCKS) - 1:
            w_sp //= 2
    return params


def run_blocks(x, params, first_block, last_block, wanted):
    """Run conv blocks [first_block, last_block] (1-based, inclusive).

    x: NHWC bf16 (C padded to >= 8).  Returns (captured relu features as NHWC,
    activation after the last block — pooled except for block 4).
    """
    feats = {}
    idx = sum(BLOCKS[i][0] for i in range(first_block - 1))
    cur = x
    for blk in range(first_block, last_block + 1):
        nconv, _ = BLOCKS[blk - 1]
        for cnv in range(1, nconv + 1):
            w_band, b_row = params[idx]
            idx += 1
            last_of_block = (cnv == nconv)
            has_pool = last_of_block and (blk < len(BLOCKS))
            if has_pool:
                feat, nxt = conv3x3_relu_pool(cur, w_band, b_row)
            else:
                feat = conv3x3_relu(cur, w_band, b_row)
                nxt = feat
            name = f"relu{blk}_{cnv}"
            if name in wanted:
                feats[name] = feat
            cur = nxt
    return feats, cur


# ----------------------------------------------------------------------------
# VGG16Loss.forward equivalent
# ----------------------------------------------------------------------------
def preprocess(img_nchw):
    """NCHW -> NHWC bf16, RGB channels zero-padded to 8 for aligned matmul K."""
    x = jnp.transpose(img_nchw, (0, 2, 3, 1)).astype(jnp.float32)
    c = x.shape[-1]
    if c < 8:
        x = jnp.pad(x, ((0, 0), (0, 0), (0, 0), (0, 8 - c)))
    return x.astype(ACT_DTYPE)


def make_style_targets(style_nchw, params):
    """Style Gram targets, captured once (mirrors the PyTorch __init__)."""
    feats, _ = run_blocks(preprocess(style_nchw), params, 1, 4, set(STYLE_LAYERS))
    return {name: gram_matrix(f) for name, f in feats.items()}


def vgg16_loss(input_nchw, content_nchw, style_grams, params,
               content_weight=CONTENT_WEIGHT, style_weight=STYLE_WEIGHT,
               tv_weight=TV_WEIGHT):
    b_in = input_nchw.shape[0]

    # Batched 'capture' + 'loss' pass for blocks 1-2: [input; content] together.
    x_all = preprocess(jnp.concatenate([input_nchw, content_nchw], axis=0))
    feats12, pooled2 = run_blocks(x_all, params, 1, 2, {"relu1_2", "relu2_2"})

    relu1_2_in = feats12["relu1_2"][:b_in]
    relu2_2_in = feats12["relu2_2"][:b_in]
    relu2_2_ct = feats12["relu2_2"][b_in:]

    # Blocks 3-4 on the input half only.
    feats34, _ = run_blocks(pooled2[:b_in], params, 3, 4,
                            {"relu3_3", "relu4_3"})

    in_feats = {"relu1_2": relu1_2_in, "relu2_2": relu2_2_in,
                "relu3_3": feats34["relu3_3"], "relu4_3": feats34["relu4_3"]}
    content_feats = {"relu2_2": relu2_2_ct}

    total_content = sum(
        content_weight * mse(in_feats[n], content_feats[n])
        for n in CONTENT_LAYERS
    )

    total_style = 0.0
    for n in STYLE_LAYERS:
        total_style = total_style + style_weight * style_layer_mse(
            in_feats[n], style_grams[n])

    total = total_content + total_style
    if tv_weight:  # trace-time guard: TV_WEIGHT == 0 -> no TV kernel traced
        total = total + tv_weight * total_variation(preprocess(input_nchw))
    return total


if __name__ == "__main__":
    key = jax.random.PRNGKey(0)
    kp, ki, kc, ks = jax.random.split(key, 4)

    B, H, W = 2, 16, 16
    params = init_params(kp, W)

    input_img = jax.random.uniform(ki, (B, 3, H, W), jnp.float32)
    content_img = jax.random.uniform(kc, (B, 3, H, W), jnp.float32)
    style_img = jax.random.uniform(ks, (1, 3, H, W), jnp.float32)

    # Style targets captured once, reused for every loss evaluation.
    style_grams = jax.block_until_ready(make_style_targets(style_img, params))

    loss_fn = jax.jit(lambda inp, cont: vgg16_loss(inp, cont, style_grams, params))
    loss = jax.block_until_ready(loss_fn(input_img, content_img))
    assert jnp.isfinite(loss)
    print("KERNEL_OK")
</pallas_src>

<mosaic_0001>
module attributes {stable_mosaic.version = 11 : i64} {
  func.func @_conv3x3_relu_kernel(%arg0: i32, %arg1: memref<1x18x144xbf16, #tpu.memory_space<vmem>>, %arg2: memref<3x144x128xbf16, #tpu.memory_space<vmem>>, %arg3: memref<1x128xf32, #tpu.memory_space<vmem>>, %arg4: memref<1x16x128xbf16, #tpu.memory_space<vmem>>) attributes {dimension_semantics = [#tpu.dimension_semantics<arbitrary>], iteration_bounds = array<i64: 1>, scalar_prefetch = 0 : i64, scratch_operands = 0 : i64, tpu.core_type = #tpu.core_type<tc>, window_params = [{pipeline_mode = #tpu.pipeline_mode<synchronous>, transform_indices = @transform_0, window_bounds = array<i64: 1, 18, 144>}, {pipeline_mode = #tpu.pipeline_mode<synchronous>, transform_indices = @transform_1, window_bounds = array<i64: 3, 144, 128>}, {pipeline_mode = #tpu.pipeline_mode<synchronous>, transform_indices = @transform_2, window_bounds = array<i64: 1, 128>}, {pipeline_mode = #tpu.pipeline_mode<synchronous>, transform_indices = @transform_3, window_bounds = array<i64: 1, 16, 128>}]} {
    %c0 = arith.constant 0 : index
    %c0_0 = arith.constant 0 : index
    %0 = vector.load %arg3[%c0, %c0_0] : memref<1x128xf32, #tpu.memory_space<vmem>>, vector<1x128xf32>
    %c0_1 = arith.constant 0 : index
    %c0_2 = arith.constant 0 : index
    %c0_3 = arith.constant 0 : index
    %1 = vector.load %arg1[%c0_1, %c0_2, %c0_3] : memref<1x18x144xbf16, #tpu.memory_space<vmem>>, vector<1x18x144xbf16>
    %2 = vector.shape_cast %1 : vector<1x18x144xbf16> to vector<18x144xbf16>
    %3 = arith.extf %2 : vector<18x144xbf16> to vector<18x144xf32>
    %cst = arith.constant 0.000000e+00 : f32
    %4 = vector.broadcast %cst : f32 to vector<16x128xf32>
    %5 = vector.extract_strided_slice %3 {offsets = [0, 0], sizes = [16, 144], strides = [1, 1]} : vector<18x144xf32> to vector<16x144xf32>
    %6 = arith.truncf %5 : vector<16x144xf32> to vector<16x144xbf16>
    %c0_4 = arith.constant 0 : index
    %c0_5 = arith.constant 0 : index
    %c0_6 = arith.constant 0 : index
    %7 = vector.load %arg2[%c0_4, %c0_5, %c0_6] : memref<3x144x128xbf16, #tpu.memory_space<vmem>>, vector<1x144x128xbf16>
    %8 = vector.shape_cast %7 : vector<1x144x128xbf16> to vector<144x128xbf16>
    %cst_7 = arith.constant dense<0.000000e+00> : vector<16x128xf32>
    %9 = tpu.matmul %6, %8, %cst_7 {dimension_numbers = #tpu.dot_dimension_numbers<[1], [0], [0], [1], [0, 0, 1, 1], [], []>} : vector<16x144xbf16>, vector<144x128xbf16>, vector<16x128xf32> -> vector<16x128xf32>
    %10 = arith.addf %4, %9 : vector<16x128xf32>
    %11 = vector.extract_strided_slice %3 {offsets = [1, 0], sizes = [16, 144], strides = [1, 1]} : vector<18x144xf32> to vector<16x144xf32>
    %12 = arith.truncf %11 : vector<16x144xf32> to vector<16x144xbf16>
    %c1 = arith.constant 1 : index
    %c0_8 = arith.constant 0 : index
    %c0_9 = arith.constant 0 : index
    %13 = vector.load %arg2[%c1, %c0_8, %c0_9] : memref<3x144x128xbf16, #tpu.memory_space<vmem>>, vector<1x144x128xbf16>
    %14 = vector.shape_cast %13 : vector<1x144x128xbf16> to vector<144x128xbf16>
    %cst_10 = arith.constant dense<0.000000e+00> : vector<16x128xf32>
    %15 = tpu.matmul %12, %14, %cst_10 {dimension_numbers = #tpu.dot_dimension_numbers<[1], [0], [0], [1], [0, 0, 1, 1], [], []>} : vector<16x144xbf16>, vector<144x128xbf16>, vector<16x128xf32> -> vector<16x128xf32>
    %16 = arith.addf %10, %15 : vector<16x128xf32>
    %17 = vector.extract_strided_slice %3 {offsets = [2, 0], sizes = [16, 144], strides = [1, 1]} : vector<18x144xf32> to vector<16x144xf32>
    %18 = arith.truncf %17 : vector<16x144xf32> to vector<16x144xbf16>
    %c2 = arith.constant 2 : index
    %c0_11 = arith.constant 0 : index
    %c0_12 = arith.constant 0 : index
    %19 = vector.load %arg2[%c2, %c0_11, %c0_12] : memref<3x144x128xbf16, #tpu.memory_space<vmem>>, vector<1x144x128xbf16>
    %20 = vector.shape_cast %19 : vector<1x144x128xbf16> to vector<144x128xbf16>
    %cst_13 = arith.constant dense<0.000000e+00> : vector<16x128xf32>
    %21 = tpu.matmul %18, %20, %cst_13 {dimension_numbers = #tpu.dot_dimension_numbers<[1], [0], [0], [1], [0, 0, 1, 1], [], []>} : vector<16x144xbf16>, vector<144x128xbf16>, vector<16x128xf32> -> vector<16x128xf32>
    %22 = arith.addf %16, %21 : vector<16x128xf32>
    %23 = vector.broadcast %0 : vector<1x128xf32> to vector<16x128xf32>
    %24 = arith.addf %22, %23 : vector<16x128xf32>
    %cst_14 = arith.constant 0.000000e+00 : f32
    %25 = vector.broadcast %cst_14 : f32 to vector<16x128xf32>
    %26 = arith.maximumf %24, %25 : vector<16x128xf32>
    %27 = arith.truncf %26 : vector<16x128xf32> to vector<16x128xbf16>
    %c0_15 = arith.constant 0 : index
    %c0_16 = arith.constant 0 : index
    %c0_17 = arith.constant 0 : index
    %28 = vector.load %arg4[%c0_15, %c0_16, %c0_17] : memref<1x16x128xbf16, #tpu.memory_space<vmem>>, vector<1x16x128xbf16>
    %29 = vector.shape_cast %28 : vector<1x16x128xbf16> to vector<16x128xbf16>
    %30 = vector.shape_cast %27 : vector<16x128xbf16> to vector<1x16x128xbf16>
    tpu.vector_store %arg4[%c0_15, %c0_16, %c0_17], %30 {strides = array<i32>} : memref<1x16x128xbf16, #tpu.memory_space<vmem>>, vector<1x16x128xbf16>,
    return
  }
  func.func @transform_0(%arg0: i32) -> (i32, i32, i32) {
    %c0_i32 = arith.constant 0 : i32
    %c0_i32_0 = arith.constant 0 : i32
    %c0_i32_1 = arith.constant 0 : i32
    %c0_i32_2 = arith.constant 0 : i32
    return %c0_i32, %c0_i32_0, %c0_i32_1 : i32, i32, i32
  }
  func.func @transform_1(%arg0: i32) -> (i32, i32, i32) {
    %c0_i32 = arith.constant 0 : i32
    %c0_i32_0 = arith.constant 0 : i32
    %c0_i32_1 = arith.constant 0 : i32
    %c0_i32_2 = arith.constant 0 : i32
    return %c0_i32, %c0_i32_0, %c0_i32_1 : i32, i32, i32
  }
  func.func @transform_2(%arg0: i32) -> (i32, i32) {
    %c0_i32 = arith.constant 0 : i32
    %c0_i32_0 = arith.constant 0 : i32
    %c0_i32_1 = arith.constant 0 : i32
    return %c0_i32, %c0_i32_0 : i32, i32
  }
  func.func @transform_3(%arg0: i32) -> (i32, i32, i32) {
    %c0_i32 = arith.constant 0 : i32
    %c0_i32_0 = arith.constant 0 : i32
    %c0_i32_1 = arith.constant 0 : i32
    %c0_i32_2 = arith.constant 0 : i32
    return %c0_i32, %c0_i32_0, %c0_i32_1 : i32, i32, i32
  }
}

</mosaic_0001>

<bundles_post_ra>
// kernel: tpu_custom_call.1
= control target key start
LH: loop header
LB: loop body
LE: loop exit
PB: predicated region body
PF: predicated region fallthrough
CT: control target
= control target key end

     0   :  { %8 = vsyncpa [#allocation3], 0  ;;  %s759_s0 = inlined_call_operand.hbm [shape: bf16[1,18,144], index: 0, kind: input, shape index: {}]   ;;  %s760_s1 = inlined_call_operand.hbm [shape: bf16[3,144,128], index: 1, kind: input, shape index: {}]   ;;  %s761_s2 = inlined_call_operand.vmem [shape: f32[1,128], index: 2, kind: input, shape index: {}]   ;;  %s762_s3 = inlined_call_operand.hbm [shape: bf16[1,16,128], index: 3, kind: output, shape index: {}]  }
   0x1   :  { %9 = vsyncpa [#allocation6], 0 }
   0x2   :  { %10 = vsyncpa [#allocation4], 0  ;;  %s642_s12 = smov [#allocation2]   ;;  %s570_s16 = scalar_lea.hbm %s759_s0, 384 }
   0x3   :  { %s16_s13 = sshll.u32 %s642_s12, 4  ;;  %p571_p0 = scmp.ne.s32.totalorder %s759_s0, %s570_s16  ;;  %s17_s13 = int_to_ptr.vmem [resolvable:$true] %s16_s13 }
   0x4   :  { %p574_p1 = scmp.lt.u32.totalorder %s570_s16, %s759_s0 }
   0x6   :  { %p576_p2 = pnand %p574_p1, %p571_p0 }
   0x8   :  { %579 = shalt.err (!%p576_p2)
}
   0x9   :  { %s580_s21 = scalar_lea.vmem %s17_s13, 384  ;;  %p585_p4 = scmp.lt.s32.totalorder %s17_s13, %s17_s13 }
   0xa   :  { %p581_p3 = scmp.ne.s32.totalorder %s17_s13, %s580_s21  ;;  %p586_p5 = scmp.lt.s32.totalorder %s580_s21, %s580_s21 }
   0xc   :  { %p587_p6 = por %p586_p5, %p585_p4 }
   0xe   :  { %p588_p7 = pnand %p587_p6, %p581_p3 }
  0x10   :  { %591 = shalt.err (!%p588_p7)
}
  0x11   :  { %s643_s22 = smov 128   ;;  %s644_s23 = smov 8  }
  0x12   :  { %22 = dma.hbm_to_vmem [thread:$0]  %s759_s0, 384, %s17_s13, [#allocation3], %s643_s22, %s643_s22, %s644_s23  }
  0x13   :  { %s645_s26 = smov [#allocation5]   ;;  %s592_s30 = scalar_lea.hbm %s760_s1, 3456 }
  0x14   :  { %s28_s27 = sshll.u32 %s645_s26, 4  ;;  %p593_p8 = scmp.ne.s32.totalorder %s760_s1, %s592_s30  ;;  %s29_s27 = int_to_ptr.vmem [resolvable:$true] %s28_s27 }
  0x15   :  { %p596_p9 = scmp.lt.u32.totalorder %s592_s30, %s760_s1 }
  0x17   :  { %p598_p10 = pnand %p596_p9, %p593_p8 }
  0x19   :  { %601 = shalt.err (!%p598_p10)
}
  0x1a   :  { %s602_s8 = scalar_lea.vmem %s29_s27, 3456  ;;  %p607_p12 = scmp.lt.s32.totalorder %s29_s27, %s29_s27 }
  0x1b   :  { %p603_p11 = scmp.ne.s32.totalorder %s29_s27, %s602_s8  ;;  %p608_p13 = scmp.lt.s32.totalorder %s602_s8, %s602_s8 }
  0x1d   :  { %p609_p0 = por %p608_p13, %p607_p12 }
  0x1f   :  { %p610_p1 = pnand %p609_p0, %p603_p11 }
  0x21   :  { %613 = shalt.err (!%p610_p1)
}
  0x22   :  { %s646_s0 = smov 64   ;;  %s647_s9 = smov 4  }
  0x23   :  { %34 = dma.hbm_to_vmem [thread:$0]  %s760_s1, 3456, %s29_s27, [#allocation6], %s646_s0, %s646_s0, %s647_s9  }
  0x24   :  { %636 = dma.done.wait [#allocation3], 384  }
  0x25   :  { %637 = vsyncadd [#allocation3], 4294966912 }
  0x26   :  { %638 = dma.done.wait [#allocation6], 3456  }
  0x27   :  { %639 = vsyncadd [#allocation6], 4294963840  ;;  %v648_v0 = vmov 0   ;;  %v538_v1 = vld [vmem:[#allocation5 + $0x48] sm:$0xff]   ;;  %v539_v2 = vld [vmem:[#allocation5] sm:$0xff]   ;;  %vm175_vm0 = vcmask 130048  }
  0x28   :  { %179 = vmatprep.subr.bf16.mxu0 %v648_v0  ;;  %276 = vmatprep.subr.bf16.mxu1 %v648_v0  ;;  %v540_v3 = vld [vmem:[#allocation5 + $0x50] sm:$0xff]   ;;  %v541_v4 = vld [vmem:[#allocation5 + $0x8] sm:$0xff]   ;;  %v542_v5 = vld [vmem:[#allocation5 + $0x58] sm:$0xff]   ;;  %vm95_vm1 = vsmask.f32 7424  ;;  %vm340_vm2 = vcmask 1046528  }
  0x29   :  { %180 = vmatpush1.bf16.msra.mxu0 %v538_v1  ;;  %277 = vmatpush1.bf16.msra.mxu1 %v539_v2  ;;  %v543_v6 = vld [vmem:[#allocation5 + $0x10] sm:$0xff]   ;;  %v544_v7 = vld [vmem:[#allocation5 + $0x60] sm:$0xff]   ;;  %v545_v8 = vld [vmem:[#allocation5 + $0x18] sm:$0xff]   ;;  %s649_s13 = smov [#allocation7]  }
  0x2a   :  { %181 = vmatprep.subr.bf16.mxu0 %v648_v0  ;;  %278 = vmatprep.subr.bf16.mxu1 %v648_v0  ;;  %v546_v9 = vld [vmem:[#allocation5 + $0x68] sm:$0xff]   ;;  %v547_v10 = vld [vmem:[#allocation5 + $0x20] sm:$0xff]   ;;  %v548_v11 = vld [vmem:[#allocation5 + $0x70] sm:$0xff]   ;;  %s473_s14 = sshll.u32 %s649_s13, 4  ;;  %s474_s14 = int_to_ptr.vmem [resolvable:$true] %s473_s14 }
  0x2b   :  { %v549_v12 = vld [vmem:[#allocation5 + $0x28] sm:$0xff]   ;;  %v47_v13 = vld [vmem:[#allocation2 + $0x10] sm:$0x11]  ;;  %v551_v21 = vld [vmem:[#allocation5 + $0x30] sm:$0xff]   ;;  %s614_s15 = scalar_lea.vmem %s474_s14, 128  ;;  %p619_p3 = scmp.lt.s32.totalorder %s474_s14, %s474_s14 }
  0x2c   :  { %v556_v14 = vld [vmem:[#allocation2 + $0x4] ss:$8 sps:$4 sm:$0xff]   ;;  %v489_v15 = vcombine.high %v47_v13, %v47_v13  ;;  %v708_v16 = vld [vmem:[#allocation2] ss:$8 sps:$4 sm:$0xff]   ;;  %v550_v20 = vld [vmem:[#allocation5 + $0x78] sm:$0xff]   ;;  %v712_v22 = vcombine.low %v47_v13, %v47_v13  ;;  %p615_p2 = scmp.ne.s32.totalorder %s474_s14, %s614_s15  ;;  %p620_p4 = scmp.lt.s32.totalorder %s614_s15, %s614_s15 }
  0x2d   :  { %182 = vmatpush1.bf16.msra.mxu0 %v540_v3  ;;  %279 = vmatpush1.bf16.msra.mxu1 %v541_v4  ;;  %v109_v17 = vshrl.u32 %v556_v14, 16  ;;  %v111_v18 = vshll.u32 %v556_v14, 16  ;;  %v99_v23 = vshll.u32 %v708_v16, 16  ;;  %v552_v26 = vld [vmem:[#allocation5 + $0x80] sm:$0xff]   ;;  %v97_v27 = vshrl.u32 %v708_v16, 16  ;;  %v553_v31 = vld [vmem:[#allocation5 + $0x38] sm:$0xff]  }
  0x2e   :  { %183 = vmatprep.subr.bf16.mxu0 %v648_v0  ;;  %280 = vmatprep.subr.bf16.mxu1 %v648_v0  ;;  %v116_v19 = vshll.u32 %v489_v15, 16  ;;  %v104_v30 = vshll.u32 %v712_v22, 16  ;;  %v554_v33 = vld [vmem:[#allocation5 + $0x88] sm:$0xff]   ;;  %v555_v36 = vld [vmem:[#allocation5 + $0x40] sm:$0xff]   ;;  %v344_v37 = vrot.slane %v556_v14, 1  ;;  %v345_v38 = vrot.slane %v489_v15, 1  ;;  %p621_p5 = por %p620_p4, %p619_p3 }
  0x2f   :  { %509 = vmatprep.mubr.msk.bf16.mxu1 %vm175_vm0, %v556_v14  ;;  %v113_v24 = vrot.slane %v111_v18, 1  ;;  %v101_v29 = vrot.slane %v99_v23, 1  ;;  %v561_v40 = vld [vmem:[#allocation5 + $0x90] sm:$0xff]   ;;  %v562_v42 = vld [vmem:[#allocation5 + $0x98] sm:$0xff]   ;;  %v563_v43 = vld [vmem:[#allocation5 + $0xa0] sm:$0xff]   ;;  %v341_v50 = vrot.slane %v708_v16, 1 }
  0x30   :  { %v118_v25 = vrot.slane %v116_v19, 1  ;;  %v106_v35 = vrot.slane %v104_v30, 1  ;;  %v346_v41 = vsel %vm340_vm2, %v344_v37, %v345_v38  ;;  %v564_v44 = vld [vmem:[#allocation5 + $0xa8] sm:$0xff]   ;;  %v565_v45 = vld [vmem:[#allocation5 + $0xb0] sm:$0xff]   ;;  %v566_v46 = vld [vmem:[#allocation5 + $0xb8] sm:$0xff]   ;;  %v342_v51 = vrot.slane %v712_v22, 1  ;;  %p622_p6 = pnand %p621_p5, %p615_p2 }
  0x31   :  { %184 = vmatpush1.bf16.msra.mxu0 %v542_v5  ;;  %281 = vmatpush1.bf16.msra.mxu1 %v543_v6  ;;  %v114_v28 = vor.u32 %v113_v24, %v109_v17  ;;  %v102_v34 = vor.u32 %v101_v29, %v97_v27  ;;  %v567_v47 = vld [vmem:[#allocation5 + $0xc0] sm:$0xff]   ;;  %v568_v48 = vld [vmem:[#allocation5 + $0xc8] sm:$0xff]   ;;  %v569_v49 = vld [vmem:[#allocation5 + $0xd0] sm:$0xff]  }
  0x32   :  { %185 = vmatprep.subr.bf16.mxu0 %v648_v0  ;;  %282 = vmatprep.subr.bf16.mxu1 %v648_v0  ;;  %v343_v52 = vsel %vm340_vm2, %v341_v50, %v342_v51  ;;  %v520_v63 = vld [vmem:[%s761_s2] ss:$0 sm:$0xff] }
  0x33   :  { %v119_v32 = vsel %vm95_vm1, %v114_v28, %v118_v25  ;;  %v107_v39 = vsel %vm95_vm1, %v102_v34, %v106_v35 }
  0x34   :  { %499 = vmatprep.mubr.msk.bf16.mxu0 %vm175_vm0, %v119_v32 }
  0x35   :  { %186 = vmatpush1.bf16.msra.mxu0 %v544_v7  ;;  %283 = vmatpush1.bf16.msra.mxu1 %v545_v8 }
  0x36   :  { %187 = vmatprep.subr.bf16.mxu0 %v648_v0  ;;  %284 = vmatprep.subr.bf16.mxu1 %v648_v0 }
  0x39   :  { %188 = vmatpush1.bf16.msra.mxu0 %v546_v9  ;;  %285 = vmatpush1.bf16.msra.mxu1 %v547_v10 }
  0x3a   :  { %189 = vmatprep.subr.bf16.mxu0 %v648_v0  ;;  %286 = vmatprep.subr.bf16.mxu1 %v648_v0 }
  0x3d   :  { %190 = vmatpush1.bf16.msra.mxu0 %v548_v11  ;;  %287 = vmatpush1.bf16.msra.mxu1 %v549_v12 }
  0x3e   :  { %191 = vmatprep.subr.bf16.mxu0 %v648_v0  ;;  %288 = vmatprep.subr.bf16.mxu1 %v648_v0 }
  0x41   :  { %192 = vmatpush1.bf16.msra.mxu0 %v550_v20  ;;  %289 = vmatpush1.bf16.msra.mxu1 %v551_v21 }
  0x42   :  { %193 = vmatprep.subr.bf16.mxu0 %v648_v0  ;;  %290 = vmatprep.subr.bf16.mxu1 %v648_v0 }
  0x45   :  { %194 = vmatpush1.bf16.msra.mxu0 %v552_v26  ;;  %291 = vmatpush1.bf16.msra.mxu1 %v553_v31 }
  0x46   :  { %195 = vmatprep.subr.bf16.mxu0 %v648_v0  ;;  %292 = vmatprep.subr.bf16.mxu1 %v648_v0 }
  0x49   :  { %196 = vmatpush1.bf16.msra.mxu0 %v554_v33  ;;  %293 = vmatpush1.bf16.msra.mxu1 %v555_v36 }
  0x4a   :  { %405 = vmatprep.subr.bf16.mxu0 %v648_v0 }
  0x4c   :  { %212 = vmatmul.mubr.bf16.vlgmr.msra.gmra.mrb[0].mxu0 %v107_v39  ;;  %309 = vmatmul.mubr.bf16.vlgmr.msra.gmra.mrb[0].mxu1 %v708_v16 }
  0x4d   :  { %406 = vmatpush1.bf16.msra.mxu0 %v561_v40  ;;  %519 = vmatprep.mubr.msk.bf16.mxu0 %vm175_vm0, %v346_v41 }
  0x4e   :  { %407 = vmatprep.subr.bf16.mxu0 %v648_v0 }
  0x51   :  { %408 = vmatpush1.bf16.msra.mxu0 %v562_v42 }
  0x52   :  { %409 = vmatprep.subr.bf16.mxu0 %v648_v0 }
  0x55   :  { %410 = vmatpush1.bf16.msra.mxu0 %v563_v43 }
  0x56   :  { %411 = vmatprep.subr.bf16.mxu0 %v648_v0 }
  0x59   :  { %412 = vmatpush1.bf16.msra.mxu0 %v564_v44 }
  0x5a   :  { %413 = vmatprep.subr.bf16.mxu0 %v648_v0 }
  0x5d   :  { %414 = vmatpush1.bf16.msra.mxu0 %v565_v45 }
  0x5e   :  { %415 = vmatprep.subr.bf16.mxu0 %v648_v0 }
  0x61   :  { %416 = vmatpush1.bf16.msra.mxu0 %v566_v46 }
  0x62   :  { %417 = vmatprep.subr.bf16.mxu0 %v648_v0 }
  0x65   :  { %418 = vmatpush1.bf16.msra.mxu0 %v567_v47 }
  0x66   :  { %419 = vmatprep.subr.bf16.mxu0 %v648_v0 }
  0x69   :  { %420 = vmatpush1.bf16.msra.mxu0 %v568_v48 }
  0x6a   :  { %421 = vmatprep.subr.bf16.mxu0 %v648_v0 }
  0x6d   :  { %422 = vmatpush1.bf16.msra.mxu0 %v569_v49 }
  0x70   :  { %438 = vmatmul.mubr.bf16.vlgmr.msra.gmra.mrb[4].mxu0 %v343_v52 }
 0x11f   :  { %v213_v53 = vpop.f32.mrb[0].mxu0  ;;  %v310_v54 = vpop.f32.mrb[0].mxu1 }
 0x120   :  { %v215_v55 = vpop.f32.mrb[1].mxu0  ;;  %v311_v56 = vadd.f32 %v310_v54, %v213_v53  ;;  %v312_v57 = vpop.f32.mrb[1].mxu1 }
 0x121   :  { %v216_v58 = vpop.f32.mrb[2].mxu0  ;;  %v313_v59 = vpop.f32.mrb[2].mxu1 }
 0x122   :  { %v218_v60 = vpop.f32.mrb[3].mxu0  ;;  %v314_v61 = vadd.f32 %v313_v59, %v216_v58  ;;  %v315_v62 = vpop.f32.mrb[3].mxu1 }
 0x143   :  { %v439_v1 = vpop.f32.mrb[4].mxu0 }
 0x144   :  { %v446_v0 = vadd.f32 %v439_v1, %v311_v56  ;;  %v441_v2 = vpop.f32.mrb[5].mxu0 }
 0x145   :  { %v442_v3 = vpop.f32.mrb[6].mxu0 }
 0x146   :  { %v454_v4 = vadd.f32 %v520_v63, %v446_v0  ;;  %v447_v5 = vadd.f32 %v442_v3, %v314_v61  ;;  %v444_v6 = vpop.f32.mrb[7].mxu0 }
 0x148   :  { %v455_v7 = vadd.f32 %v520_v63, %v447_v5  ;;  %v456_v8 = vmax.f32 %v454_v4, 0.0 }
 0x14a   :  { %v457_v9 = vmax.f32 %v455_v7, 0.0 }
 0x14c   :  { %v528_v10 = vpack.c.bf16 %v457_v9, %v456_v8 }
 0x14e   :  { %529 = vst [vmem:[#allocation7] sm:$0xff] %v528_v10  }
 0x14f   :  { %625 = shalt.err (!%p622_p6)
}
 0x150   :  { %s626_s17 = scalar_lea.hbm %s762_s3, 128 }
 0x151   :  { %p627_p7 = scmp.ne.s32.totalorder %s762_s3, %s626_s17  ;;  %p630_p8 = scmp.lt.u32.totalorder %s626_s17, %s762_s3 }
 0x153   :  { %p632_p9 = pnand %p630_p8, %p627_p7 }
 0x155   :  { %635 = shalt.err (!%p632_p9)
}
 0x156   :  { %479 = dma.vmem_to_hbm [thread:$0]  %s474_s14, 128, %s762_s3, [#allocation4], %s646_s0, %s646_s0, %s647_s9  }
 0x157   :  { %640 = dma.done.wait [#allocation4], 128  }
 0x158   :  { %641 = vsyncadd [#allocation4], 4294967168 }
 0x159   :  { %483 = vsyncpa [#allocation3], 1 }
 0x15a   :  { %484 = vsyncpa [#allocation6], 1 }
 0x15b   :  { %485 = vsyncpa [#allocation4], 1 }

</bundles_post_ra>
